<compile_context>
chip_gen: v7x
topology: tpu7x:2x2x1
jax: 0.10.0
libtpu: 0.0.40
codegen_flags: <defaults>
</compile_context>

<pallas_src>
import jax
import jax.numpy as jnp
from jax.experimental import pallas as pl
from jax.experimental.pallas import tpu as pltpu


# ---------------------------------------------------------------------------
# Kernel
# ---------------------------------------------------------------------------
def _attn_connector_kernel(q_ref, k_ref, c_ref,
                           wq_ref, wk_ref, wab_ref, wproj_ref,
                           out_ref):
    """One batch tile per invocation; everything fits VMEM at these shapes.

    q_ref    : (bt, Dq+1)        queries with a trailing ones column (bias)
    k_ref    : (bt*K, Dk+1)      keys, flattened + ones column (bias)
    c_ref    : (bt, K, Dc)       contents
    wq_ref   : (Dq+1, A)         query_embed weight with bias as last row
    wk_ref   : (Dk+1, A)         key_embed weight with bias as last row
    wab_ref  : (2, A)            row 0 = attn_w weight, row 1 = attn_w bias (bcast)
    wproj_ref: (Dc+Dq+1, W)      fused projection(s): rows [0:Dc] mix-part,
                                 [Dc:Dc+Dq] query-part, last row bias.
                                 W = 2*O (lstm: h | c side-by-side) or O (gru).
    out_ref  : (bt, W)
    """
    queries_aug = q_ref[...].astype(jnp.float32)       # (bt, Dq+1)
    keys_flat = k_ref[...].astype(jnp.float32)         # (bt*K, Dk+1)
    contents = c_ref[...].astype(jnp.float32)          # (bt, K, Dc)

    bt, K, _ = contents.shape

    # Embeddings (bias folded via the ones column) — two MXU pushes.
    qe = jnp.dot(queries_aug, wq_ref[...],
                 preferred_element_type=jnp.float32)               # (bt, A)
    ke = jnp.dot(keys_flat, wk_ref[...],
                 preferred_element_type=jnp.float32)               # (bt*K, A)
    A = qe.shape[1]
    # Leading-dim split only (pure view when K % 8 == 0, no lane/sublane move).
    ke = ke.reshape(bt, K, A)                                       # (bt, K, A)

    # fc1 = tanh(tiled_query + key_embed)   (EUP tanh, VPU add)
    fc1 = jnp.tanh(qe[:, None, :] + ke)                             # (bt, K, A)

    # attn logits: VPU multiply + lane reduce (kept off the MXU on purpose:
    # a width-1 matmul output would be worst-case masked stores).
    wab = wab_ref[...]                                              # (2, A)
    logits = jnp.sum(fc1 * wab[0:1, :][None, :, :], axis=-1)        # (bt, K)
    logits = logits + wab[1:2, 0:1]                                 # + attn bias
    attn = jax.nn.sigmoid(logits)                                   # (bt, K)

    # mix = bmm(attn[:, None, :], contents).squeeze(1)
    mix = jnp.sum(attn[:, :, None] * contents, axis=1)              # (bt, Dc)

    # Fused projection: one MXU push producing h (and c for lstm) side-by-side.
    proj_in = jnp.concatenate([mix, queries_aug], axis=1)           # (bt, Dc+Dq+1)
    out = jnp.dot(proj_in, wproj_ref[...],
                  preferred_element_type=jnp.float32)               # (bt, W)

    out_ref[...] = out.astype(out_ref.dtype)


# ---------------------------------------------------------------------------
# Wrapper
# ---------------------------------------------------------------------------
def _pack_params(params, rnn_cell):
    """Fold biases into weight slabs and fuse the projections (wrapper-side XLA)."""
    A = params["wq"].shape[1]
    wq_aug = jnp.concatenate([params["wq"], params["bq"]], axis=0)          # (Dq+1, A)
    wk_aug = jnp.concatenate([params["wk"], params["bk"]], axis=0)          # (Dk+1, A)
    wab = jnp.concatenate(
        [params["wa"], jnp.broadcast_to(params["ba"], (1, A))], axis=0)     # (2, A)

    if rnn_cell == "lstm":
        # (Dc+Dq+1, 2*O): columns [0:O] = h path, [O:2O] = c path; bias last row.
        wproj = jnp.concatenate([
            jnp.concatenate([params["wh_mix"], params["wc_mix"]], axis=1),
            jnp.concatenate([params["wh_q"], params["wc_q"]], axis=1),
            jnp.concatenate([params["bh"], params["bc"]], axis=1),
        ], axis=0)
    else:
        # gru/plain: single projection only — the c path is never computed.
        wproj = jnp.concatenate(
            [params["wh_mix"], params["wh_q"], params["bh"]], axis=0)       # (Dc+Dq+1, O)
    return wq_aug, wk_aug, wab, wproj


def attn_connector_forward(queries, keys, contents, params, rnn_cell="lstm"):
    """Pallas-backed AttnConnector.forward.

    Returns (h, c), each (1, B, O), for 'lstm'; otherwise a single (1, B, O).
    """
    B, K, Dk = keys.shape
    Dq = queries.shape[1]
    Dc = contents.shape[2]
    O = params["wh_mix"].shape[1]
    W = 2 * O if rnn_cell == "lstm" else O

    # Wrapper-side prep (free XLA layout/concat ops, hoisted out of the kernel):
    queries_aug = jnp.concatenate(
        [queries, jnp.ones((B, 1), queries.dtype)], axis=1)                 # (B, Dq+1)
    keys_flat_aug = jnp.concatenate(
        [keys.reshape(B * K, Dk), jnp.ones((B * K, 1), keys.dtype)], axis=1)  # (B*K, Dk+1)
    wq_aug, wk_aug, wab, wproj = _pack_params(params, rnn_cell)

    # Batch tiling: 128-row blocks when B allows (pipelines DMA, shards across
    # v7x's 2 TensorCores, matches v5e's 128-granular MXU); else one block.
    bt = 128 if (B >= 128 and B % 128 == 0) else B
    grid = (B // bt,)

    out = pl.pallas_call(
        _attn_connector_kernel,
        out_shape=jax.ShapeDtypeStruct((B, W), queries.dtype),
        grid_spec=pltpu.PrefetchScalarGridSpec(
            num_scalar_prefetch=0,
            grid=grid,
            in_specs=[
                pl.BlockSpec((bt, Dq + 1), lambda i: (i, 0)),
                pl.BlockSpec((bt * K, Dk + 1), lambda i: (i, 0)),
                pl.BlockSpec((bt, K, Dc), lambda i: (i, 0, 0)),
                pl.BlockSpec(wq_aug.shape, lambda i: (0, 0)),
                pl.BlockSpec(wk_aug.shape, lambda i: (0, 0)),
                pl.BlockSpec(wab.shape, lambda i: (0, 0)),
                pl.BlockSpec(wproj.shape, lambda i: (0, 0)),
            ],
            out_specs=pl.BlockSpec((bt, W), lambda i: (i, 0)),
        ),
        compiler_params=pltpu.CompilerParams(
            dimension_semantics=("parallel",)),
    )(queries_aug, keys_flat_aug, contents, wq_aug, wk_aug, wab, wproj)

    if rnn_cell == "lstm":
        return out[None, :, :O], out[None, :, O:]
    return out[None]


# ---------------------------------------------------------------------------
# Pure-JAX reference mirroring the PyTorch module
# ---------------------------------------------------------------------------
def _reference_forward(queries, keys, contents, p, rnn_cell="lstm"):
    qe = queries @ p["wq"] + p["bq"]                     # (B, A)
    ke = keys @ p["wk"] + p["bk"]                        # (B, K, A)
    fc1 = jnp.tanh(qe[:, None, :] + ke)
    logits = jnp.sum(fc1 * p["wa"][0], axis=-1) + p["ba"][0, 0]
    attn = jax.nn.sigmoid(logits)                        # (B, K)
    mix = jnp.einsum("bk,bkc->bc", attn, contents)       # (B, Dc)
    out = jnp.concatenate([mix, queries], axis=1)
    wh = jnp.concatenate([p["wh_mix"], p["wh_q"]], axis=0)
    h = (out @ wh + p["bh"])[None]
    if rnn_cell == "lstm":
        wc = jnp.concatenate([p["wc_mix"], p["wc_q"]], axis=0)
        c = (out @ wc + p["bc"])[None]
        return h, c
    return h


def make_params(key, querlatent_size, kelatent_size, content_size,
                output_size, attn_size, dtype=jnp.float32):
    """Deterministic synthetic parameters (weights stored as (in, out))."""
    ks = jax.random.split(key, 10)
    s = 0.1
    return {
        "wq": s * jax.random.normal(ks[0], (querlatent_size, attn_size), dtype),
        "bq": s * jax.random.normal(ks[1], (1, attn_size), dtype),
        "wk": s * jax.random.normal(ks[2], (kelatent_size, attn_size), dtype),
        "bk": s * jax.random.normal(ks[3], (1, attn_size), dtype),
        "wa": s * jax.random.normal(ks[4], (1, attn_size), dtype),
        "ba": s * jax.random.normal(ks[5], (1, 1), dtype),
        "wh_mix": s * jax.random.normal(ks[6], (content_size, output_size), dtype),
        "wh_q": s * jax.random.normal(ks[7], (querlatent_size, output_size), dtype),
        "bh": s * jax.random.normal(ks[8], (1, output_size), dtype),
        "wc_mix": s * jax.random.normal(ks[9], (content_size, output_size), dtype),
        "wc_q": s * jax.random.normal(jax.random.fold_in(key, 101),
                                      (querlatent_size, output_size), dtype),
        "bc": s * jax.random.normal(jax.random.fold_in(key, 102),
                                    (1, output_size), dtype),
    }


if __name__ == "__main__":
    B = 2
    NUM_KEY = 8
    QUER = 32      # querlatent_size
    KEL = 24       # kelatent_size
    CONTENT = 32   # content_size
    OUT = 32       # output_size
    ATTN = 16      # attn_size

    root = jax.random.PRNGKey(0)
    kq, kk, kc, kp = jax.random.split(root, 4)

    queries = jax.random.normal(kq, (B, QUER), jnp.float32)
    keys = jax.random.normal(kk, (B, NUM_KEY, KEL), jnp.float32)
    contents = jax.random.normal(kc, (B, NUM_KEY, CONTENT), jnp.float32)

    params = make_params(kp, QUER, KEL, CONTENT, OUT, ATTN)

    # lstm branch (h, c)
    h, c = attn_connector_forward(queries, keys, contents, params, rnn_cell="lstm")
    jax.block_until_ready((h, c))
    h_ref, c_ref = _reference_forward(queries, keys, contents, params, rnn_cell="lstm")
    assert h.shape == (1, B, OUT) and c.shape == (1, B, OUT)
    assert jnp.allclose(h, h_ref, atol=3e-5, rtol=1e-5)
    assert jnp.allclose(c, c_ref, atol=3e-5, rtol=1e-5)

    # gru branch (single projection; c path skipped entirely inside the kernel)
    g = attn_connector_forward(queries, keys, contents, params, rnn_cell="gru")
    jax.block_until_ready(g)
    g_ref = _reference_forward(queries, keys, contents, params, rnn_cell="gru")
    assert g.shape == (1, B, OUT)
    assert jnp.allclose(g, g_ref, atol=3e-5, rtol=1e-5)

    print("KERNEL_OK")
</pallas_src>

<mosaic_0001>
module attributes {stable_mosaic.version = 11 : i64} {
  func.func @_attn_connector_kernel(%arg0: i32, %arg1: memref<2x33xf32, #tpu.memory_space<vmem>>, %arg2: memref<16x25xf32, #tpu.memory_space<vmem>>, %arg3: memref<2x8x32xf32, #tpu.memory_space<vmem>>, %arg4: memref<33x16xf32, #tpu.memory_space<vmem>>, %arg5: memref<25x16xf32, #tpu.memory_space<vmem>>, %arg6: memref<2x16xf32, #tpu.memory_space<vmem>>, %arg7: memref<65x64xf32, #tpu.memory_space<vmem>>, %arg8: memref<2x64xf32, #tpu.memory_space<vmem>>) attributes {dimension_semantics = [#tpu.dimension_semantics<parallel>], iteration_bounds = array<i64: 1>, scalar_prefetch = 0 : i64, scratch_operands = 0 : i64, tpu.core_type = #tpu.core_type<tc>, window_params = [{transform_indices = @transform_0, window_bounds = array<i64: 2, 33>}, {transform_indices = @transform_1, window_bounds = array<i64: 16, 25>}, {transform_indices = @transform_2, window_bounds = array<i64: 2, 8, 32>}, {pipeline_mode = #tpu.pipeline_mode<synchronous>, transform_indices = @transform_3, window_bounds = array<i64: 33, 16>}, {pipeline_mode = #tpu.pipeline_mode<synchronous>, transform_indices = @transform_4, window_bounds = array<i64: 25, 16>}, {pipeline_mode = #tpu.pipeline_mode<synchronous>, transform_indices = @transform_5, window_bounds = array<i64: 2, 16>}, {pipeline_mode = #tpu.pipeline_mode<synchronous>, transform_indices = @transform_6, window_bounds = array<i64: 65, 64>}, {transform_indices = @transform_7, window_bounds = array<i64: 2, 64>}]} {
    %c0 = arith.constant 0 : index
    %c0_0 = arith.constant 0 : index
    %0 = vector.load %arg1[%c0, %c0_0] : memref<2x33xf32, #tpu.memory_space<vmem>>, vector<2x33xf32>
    %c0_1 = arith.constant 0 : index
    %c0_2 = arith.constant 0 : index
    %1 = vector.load %arg2[%c0_1, %c0_2] : memref<16x25xf32, #tpu.memory_space<vmem>>, vector<16x25xf32>
    %c0_3 = arith.constant 0 : index
    %c0_4 = arith.constant 0 : index
    %c0_5 = arith.constant 0 : index
    %2 = vector.load %arg3[%c0_3, %c0_4, %c0_5] : memref<2x8x32xf32, #tpu.memory_space<vmem>>, vector<2x8x32xf32>
    %c0_6 = arith.constant 0 : index
    %c0_7 = arith.constant 0 : index
    %3 = vector.load %arg4[%c0_6, %c0_7] : memref<33x16xf32, #tpu.memory_space<vmem>>, vector<33x16xf32>
    %cst = arith.constant dense<0.000000e+00> : vector<2x16xf32>
    %4 = tpu.matmul %0, %3, %cst {dimension_numbers = #tpu.dot_dimension_numbers<[1], [0], [0], [1], [0, 0, 1, 1], [], []>} : vector<2x33xf32>, vector<33x16xf32>, vector<2x16xf32> -> vector<2x16xf32>
    %c0_8 = arith.constant 0 : index
    %c0_9 = arith.constant 0 : index
    %5 = vector.load %arg5[%c0_8, %c0_9] : memref<25x16xf32, #tpu.memory_space<vmem>>, vector<25x16xf32>
    %cst_10 = arith.constant dense<0.000000e+00> : vector<16x16xf32>
    %6 = tpu.matmul %1, %5, %cst_10 {dimension_numbers = #tpu.dot_dimension_numbers<[1], [0], [0], [1], [0, 0, 1, 1], [], []>} : vector<16x25xf32>, vector<25x16xf32>, vector<16x16xf32> -> vector<16x16xf32>
    %7 = vector.shape_cast %6 : vector<16x16xf32> to vector<2x8x16xf32>
    %8 = vector.shape_cast %4 : vector<2x16xf32> to vector<2x1x16xf32>
    %9 = vector.broadcast %8 : vector<2x1x16xf32> to vector<2x8x16xf32>
    %10 = arith.addf %9, %7 : vector<2x8x16xf32>
    %11 = math.tanh %10 : vector<2x8x16xf32>
    %c0_11 = arith.constant 0 : index
    %c0_12 = arith.constant 0 : index
    %12 = vector.load %arg6[%c0_11, %c0_12] : memref<2x16xf32, #tpu.memory_space<vmem>>, vector<2x16xf32>
    %13 = vector.extract_strided_slice %12 {offsets = [0, 0], sizes = [1, 16], strides = [1, 1]} : vector<2x16xf32> to vector<1x16xf32>
    %14 = vector.shape_cast %13 : vector<1x16xf32> to vector<1x1x16xf32>
    %15 = vector.broadcast %14 : vector<1x1x16xf32> to vector<2x8x16xf32>
    %16 = arith.mulf %11, %15 : vector<2x8x16xf32>
    %cst_13 = arith.constant dense<0.000000e+00> : vector<2x8xf32>
    %17 = vector.multi_reduction <add>, %16, %cst_13 [2] : vector<2x8x16xf32> to vector<2x8xf32>
    %18 = vector.extract_strided_slice %12 {offsets = [1, 0], sizes = [1, 1], strides = [1, 1]} : vector<2x16xf32> to vector<1x1xf32>
    %19 = vector.broadcast %18 : vector<1x1xf32> to vector<2x8xf32>
    %20 = arith.addf %17, %19 : vector<2x8xf32>
    %21 = arith.negf %20 : vector<2x8xf32>
    %22 = math.exp %21 : vector<2x8xf32>
    %cst_14 = arith.constant 1.000000e+00 : f32
    %23 = vector.broadcast %cst_14 : f32 to vector<2x8xf32>
    %24 = arith.addf %23, %22 : vector<2x8xf32>
    %25 = arith.divf %23, %24 : vector<2x8xf32>
    %26 = vector.shape_cast %25 : vector<2x8xf32> to vector<2x8x1xf32>
    %27 = vector.broadcast %26 : vector<2x8x1xf32> to vector<2x8x32xf32>
    %28 = arith.mulf %27, %2 : vector<2x8x32xf32>
    %cst_15 = arith.constant dense<0.000000e+00> : vector<2x32xf32>
    %29 = vector.multi_reduction <add>, %28, %cst_15 [1] : vector<2x8x32xf32> to vector<2x32xf32>
    %30 = tpu.concatenate %29, %0 in 1 : vector<2x32xf32>, vector<2x33xf32> -> vector<2x65xf32>
    %c0_16 = arith.constant 0 : index
    %c0_17 = arith.constant 0 : index
    %31 = vector.load %arg7[%c0_16, %c0_17] : memref<65x64xf32, #tpu.memory_space<vmem>>, vector<65x64xf32>
    %cst_18 = arith.constant dense<0.000000e+00> : vector<2x64xf32>
    %32 = tpu.matmul %30, %31, %cst_18 {dimension_numbers = #tpu.dot_dimension_numbers<[1], [0], [0], [1], [0, 0, 1, 1], [], []>} : vector<2x65xf32>, vector<65x64xf32>, vector<2x64xf32> -> vector<2x64xf32>
    %c0_19 = arith.constant 0 : index
    %c0_20 = arith.constant 0 : index
    %33 = vector.load %arg8[%c0_19, %c0_20] : memref<2x64xf32, #tpu.memory_space<vmem>>, vector<2x64xf32>
    tpu.vector_store %arg8[%c0_19, %c0_20], %32 {strides = array<i32>} : memref<2x64xf32, #tpu.memory_space<vmem>>, vector<2x64xf32>,
    return
  }
  func.func @transform_0(%arg0: i32) -> (i32, i32) {
    %c0_i32 = arith.constant 0 : i32
    %c0_i32_0 = arith.constant 0 : i32
    return %arg0, %c0_i32 : i32, i32
  }
  func.func @transform_1(%arg0: i32) -> (i32, i32) {
    %c0_i32 = arith.constant 0 : i32
    %c0_i32_0 = arith.constant 0 : i32
    return %arg0, %c0_i32 : i32, i32
  }
  func.func @transform_2(%arg0: i32) -> (i32, i32, i32) {
    %c0_i32 = arith.constant 0 : i32
    %c0_i32_0 = arith.constant 0 : i32
    %c0_i32_1 = arith.constant 0 : i32
    return %arg0, %c0_i32, %c0_i32_0 : i32, i32, i32
  }
  func.func @transform_3(%arg0: i32) -> (i32, i32) {
    %c0_i32 = arith.constant 0 : i32
    %c0_i32_0 = arith.constant 0 : i32
    %c0_i32_1 = arith.constant 0 : i32
    return %c0_i32, %c0_i32_0 : i32, i32
  }
  func.func @transform_4(%arg0: i32) -> (i32, i32) {
    %c0_i32 = arith.constant 0 : i32
    %c0_i32_0 = arith.constant 0 : i32
    %c0_i32_1 = arith.constant 0 : i32
    return %c0_i32, %c0_i32_0 : i32, i32
  }
  func.func @transform_5(%arg0: i32) -> (i32, i32) {
    %c0_i32 = arith.constant 0 : i32
    %c0_i32_0 = arith.constant 0 : i32
    %c0_i32_1 = arith.constant 0 : i32
    return %c0_i32, %c0_i32_0 : i32, i32
  }
  func.func @transform_6(%arg0: i32) -> (i32, i32) {
    %c0_i32 = arith.constant 0 : i32
    %c0_i32_0 = arith.constant 0 : i32
    %c0_i32_1 = arith.constant 0 : i32
    return %c0_i32, %c0_i32_0 : i32, i32
  }
  func.func @transform_7(%arg0: i32) -> (i32, i32) {
    %c0_i32 = arith.constant 0 : i32
    %c0_i32_0 = arith.constant 0 : i32
    return %arg0, %c0_i32 : i32, i32
  }
}

</mosaic_0001>

<bundles_post_ra>
// kernel: tpu_custom_call.1
= control target key start
LH: loop header
LB: loop body
LE: loop exit
PB: predicated region body
PF: predicated region fallthrough
CT: control target
= control target key end

     0   :  { %v551_v3 = vmov 0.0|0.0   ;;  %vm552_vm0 = vmmov 0   ;;  %v553_v6 = vmov 0.0   ;;  %s698_s0 = inlined_call_operand.vmem [shape: f32[2,33], index: 0, kind: input, shape index: {}]   ;;  %s699_s1 = inlined_call_operand.vmem [shape: f32[16,25], index: 1, kind: input, shape index: {}]   ;;  %s700_s2 = inlined_call_operand.vmem [shape: f32[2,8,32], index: 2, kind: input, shape index: {}]   ;;  %s701_s3 = inlined_call_operand.vmem [shape: f32[33,16], index: 3, kind: input, shape index: {}]   ;;  %s702_s4 = inlined_call_operand.vmem [shape: f32[25,16], index: 4, kind: input, shape index: {}]   ;;  %s703_s5 = inlined_call_operand.vmem [shape: f32[2,16], index: 5, kind: input, shape index: {}]   ;;  %s704_s6 = inlined_call_operand.vmem [shape: f32[65,64], index: 6, kind: input, shape index: {}]   ;;  %s705_s7 = inlined_call_operand.hbm [shape: f32[2,64], index: 7, kind: output, shape index: {}]  }
   0x1   :  { %v32_v0 = vld [vmem:[%s701_s3] sm:$0xff]  ;;  %v33_v1 = vld [vmem:[%s701_s3 + $0x8] sm:$0xff]  ;;  %v34_v2 = vld [vmem:[%s701_s3 + $0x10] sm:$0xff]  ;;  %478 = vmatprep.subr.bf16.mxu0 %v551_v3  ;;  %494 = vmatprep.subr.bf16.mxu1 %v551_v3 }
   0x2   :  { %v479_v4 = vpack.c.bf16 %v33_v1, %v32_v0  ;;  %v35_v5 = vld [vmem:[%s701_s3 + $0x18] sm:$0xff]  ;;  %443 = vmatprep.mubr.msk.f32.mxu0 %vm552_vm0, %v553_v6  ;;  %475 = vmatprep.mubr.msk.f32.mxu1 %vm552_vm0, %v553_v6 }
   0x3   :  { %v482_v7 = vpack.c.bf16 %v35_v5, %v34_v2 }
   0x4   :  { %480 = vmatpush3.bf16.msra.mxu0 %v479_v4 }
   0x5   :  { %481 = vmatprep.subr.bf16.mxu0 %v551_v3 }
   0x6   :  { %12 = vsyncpa [#allocation3], 0  ;;  %v115_v8 = vld [vmem:[%s702_s4] sm:$0xff]  ;;  %v116_v9 = vld [vmem:[%s702_s4 + $0x8] sm:$0xff]  ;;  %vm41_vm1 = vcmask 1040384   ;;  %vm37_vm2 = vcmask 269312   ;;  %v208_v22 = vlaneseq }
   0x7   :  { %v117_v10 = vld [vmem:[%s702_s4 + $0x10] sm:$0xff]  ;;  %v118_v11 = vld [vmem:[%s702_s4 + $0x18] sm:$0x1]  ;;  %v36_v12 = vld [vmem:[%s701_s3 + $0x20] sm:$0x1]  ;;  %v484_v13 = vpack.c.bf16 %v116_v9, %v115_v8  ;;  %vm119_vm3 = vcmask 203776  }
   0x8   :  { %483 = vmatpush3.bf16.msra.mxu0 %v482_v7  ;;  %v27_v14 = vld [vmem:[%s698_s0] sm:$0x3]  ;;  %v488_v15 = vpack.c.bf16 %v118_v11, %v117_v10  ;;  %vm554_vm4 = vmmov 1   ;;  %v29_v17 = vld [vmem:[%s699_s1 + $0x8] sm:$0xff]  ;;  %s555_s24 = smov 32   ;;  %v209_v24 = vshrl.u32 %v208_v22, 7 }
   0x9   :  { %441 = vmatprep.subr.mxu0 %v553_v6  ;;  %v28_v16 = vld [vmem:[%s699_s1] sm:$0xff]  ;;  %vm489_vm5 = vmpackc.low %vm41_vm1, %vm554_vm4  ;;  %296 = vrot.lane.b32.xlu1 %v27_v14, %s555_s24  ;;  %v556_v20 = vmov 1966171168   ;;  %vm248_vm6 = vcmask 130048   ;;  %v301_v47 = vld [vmem:[%s704_s6 + $0x8] sm:$0xff]  ;;  %vm276_vm7 = vcmask 261120  }
   0xa   :  { %v241_v18 = vld [vmem:[%s703_s5] sm:$0x3]  ;;  %v206_v21 = vunpack.c.l.s4 %v556_v20  ;;  %v229_v30 = vsub.s32 0, %v209_v24  ;;  %v302_v48 = vld [vmem:[%s704_s6 + $0x10] sm:$0xff]  ;;  %v303_v50 = vld [vmem:[%s704_s6 + $0x18] sm:$0xff]  ;;  %vm293_vm8 = vcmask 1041409  }
   0xb   :  { %v256_v19 = vrot.slane %v241_v18, 1  ;;  %v300_v46 = vld [vmem:[%s704_s6] sm:$0xff]  ;;  %v498_v51 = vpack.c.bf16 %v303_v50, %v302_v48  ;;  %v305_v53 = vld [vmem:[%s704_s6 + $0x28] sm:$0xff]  ;;  %v306_v55 = vld [vmem:[%s704_s6 + $0x30] sm:$0xff]  ;;  %vm309_vm9 = vcmask 531456   ;;  %vm386_vm10 = vcmask 517120  }
   0xc   :  { %442 = vmatpush3.msk.msra.mxu0 %vm41_vm1, %v36_v12  ;;  %v207_v23 = vunpack.c.0.s8 %v206_v21  ;;  %v245_v39 = vrot.slane %v241_v18, %v229_v30  ;;  %v495_v49 = vpack.c.bf16 %v301_v47, %v300_v46  ;;  %v304_v52 = vld [vmem:[%s704_s6 + $0x20] sm:$0xff]  ;;  %v307_v56 = vld [vmem:[%s704_s6 + $0x38] sm:$0xff]  ;;  %v31_v9 = vld [vmem:[%s700_s2 + $0x8] sm:$0xff] }
   0xd   :  { %444 = vmatmul.mubr.msk.f32.vlgmr.msra.gmra.mrb[0].mxu0 %vm37_vm2, %v27_v14  ;;  %485 = vmatprep.subr.bf16.mxu0 %v484_v13  ;;  %506 = vpush %v256_v19  ;;  %v501_v54 = vpack.c.bf16 %v305_v53, %v304_v52  ;;  %v504_v57 = vpack.c.bf16 %v307_v56, %v306_v55  ;;  %v308_v58 = vld [vmem:[%s704_s6 + $0x40] sm:$0x1] }
   0xe   :  { %487 = vmatpush3.bf16.msra.mxu0 %v484_v13  ;;  %454 = vmatprep.mubr.msk.f32.mxu0 %vm119_vm3, %v28_v16  ;;  %v210_v25 = vsub.s32 %v207_v23, %v209_v24 }
   0xf   :  { %490 = vmatprep.subr.msk.bf16.mxu0 %vm489_vm5, %v488_v15  ;;  %496 = vmatpush3.bf16.msra.mxu1 %v495_v49 }
  0x10   :  { %497 = vmatprep.subr.bf16.mxu1 %v551_v3 }
  0x12   :  { %493 = vmatpush3.bf16.msk.msra.mxu0 %vm489_vm5, %v488_v15 }
  0x13   :  { %499 = vmatpush3.bf16.msra.mxu1 %v498_v51 }
  0x14   :  { %500 = vmatprep.subr.bf16.mxu1 %v551_v3 }
  0x15   :  { %455 = vmatmul.mubr.msk.f32.vlgmr.msra.gmra.mrb[2].mxu0 %vm119_vm3, %v29_v17 }
  0x17   :  { %502 = vmatpush3.bf16.msra.mxu1 %v501_v54 }
  0x18   :  { %503 = vmatprep.subr.bf16.mxu1 %v551_v3 }
  0x1b   :  { %505 = vmatpush3.bf16.msra.mxu1 %v504_v57 }
  0x1c   :  { %473 = vmatprep.subr.mxu1 %v553_v6  ;;  %v30_v6 = vld [vmem:[%s700_s2] sm:$0xff]  ;;  %s557_s2 = smov [#allocation2]  }
  0x1d   :  { %s394_s22 = sshll.u32 %s557_s2, 4  ;;  %s395_s22 = int_to_ptr.vmem [resolvable:$true] %s394_s22 }
  0x1e   :  { %s527_s3 = scalar_lea.vmem %s395_s22, 32  ;;  %p532_p1 = scmp.lt.s32.totalorder %s395_s22, %s395_s22 }
  0x1f   :  { %474 = vmatpush3.msk.msra.mxu1 %vm41_vm1, %v308_v58  ;;  %p528_p0 = scmp.ne.s32.totalorder %s395_s22, %s527_s3  ;;  %p533_p2 = scmp.lt.s32.totalorder %s527_s3, %s527_s3 }
  0x21   :  { %p534_p3 = por %p533_p2, %p532_p1 }
  0x23   :  { %p535_p4 = pnand %p534_p3, %p528_p0 }
  0x3e   :  { %s507_s18 = spop %506 }
  0x3f   :  { %v258_v59 = vstv %s507_s18 }
  0x7b   :  { %v297_v24 = vpop.permute.xlu1 %296 }
  0xe0   :  { %v111_v26 = vpop.f32.mrb[0].mxu0 }
  0xe1   :  { %v211_v27 = vrot.slane %v111_v26, %v210_v25  ;;  %v445_v28 = vpop.f32.mrb[1].mxu0 }
  0xe3   :  { %v212_v29 = vcombine.high %v211_v27, %v211_v27  ;;  %v219_v31 = vrot.slane %v211_v27, %v210_v25 }
  0xe5   :  { %v226_v32 = vrot.slane %v212_v29, %v210_v25  ;;  %v230_v35 = vrot.slane %v219_v31, %v229_v30 }
  0xe7   :  { %v234_v33 = vrot.slane %v226_v32, %v229_v30 }
  0xe8   :  { %v456_v34 = vpop.f32.mrb[2].mxu0 }
  0xe9   :  { %v238_v36 = vadd.f32 %v456_v34, %v234_v33  ;;  %v195_v37 = vpop.f32.mrb[3].mxu0 }
  0xea   :  { %v237_v38 = vadd.f32 %v230_v35, %v195_v37 }
  0xeb   :  { %515 = vtanh.f32 %v238_v36 }
  0xec   :  { %517 = vtanh.f32 %v237_v38 }
  0xf5   :  { %v516_v40 = vpop.eup %515 }
  0xf6   :  { %v518_v41 = vpop.eup %517  ;;  %v247_v42 = vmul.f32 %v516_v40, %v245_v39 }
  0xf7   :  { %v246_v43 = vmul.f32 %v518_v41, %v245_v39 }
  0xf8   :  { %v252_v45 = vsel %vm248_vm6, %v247_v42, 0.0 }
  0xf9   :  { %v249_v44 = vsel %vm248_vm6, %v246_v43, 0.0 }
  0xfa   :  { %250 = vadd.xlane.f32.xlu0 %v249_v44 }
  0xfe   :  { %253 = vadd.xlane.f32.xlu0 %v252_v45 }
 0x187   :  { %v251_v60 = vpop.xlane.xlu0 %250 }
 0x188   :  { %v260_v61 = vadd.f32 %v258_v59, %v251_v60 }
 0x18a   :  { %v407_v62 = vmul.f32 -1.442695, %v260_v61 }
 0x18b   :  { %v254_v63 = vpop.xlane.xlu0 %253 }
 0x18c   :  { %519 = vpow2.f32 %v407_v62  ;;  %v261_v0 = vadd.f32 %v258_v59, %v254_v63 }
 0x18e   :  { %v408_v1 = vmul.f32 -1.442695, %v261_v0 }
 0x190   :  { %521 = vpow2.f32 %v408_v1 }
 0x196   :  { %v520_v2 = vpop.eup %519 }
 0x197   :  { %v268_v3 = vadd.f32 1.0, %v520_v2 }
 0x199   :  { %523 = vrcp.f32 %v268_v3 }
 0x19a   :  { %v522_v4 = vpop.eup %521 }
 0x19b   :  { %v269_v5 = vadd.f32 1.0, %v522_v4 }
 0x19d   :  { %525 = vrcp.f32 %v269_v5 }
 0x1a3   :  { %v524_v7 = vpop.eup %523 }
 0x1a4   :  { %v274_v8 = vmul.f32 %v524_v7, %v30_v6 }
 0x1a6   :  { %v277_v10 = vsel %vm276_vm7, %v274_v8, 0.0 }
 0x1a7   :  { %v526_v11 = vpop.eup %525  ;;  %v278_v12 = vrot.slane %v277_v10, 4 }
 0x1a8   :  { %v275_v13 = vmul.f32 %v526_v11, %v31_v9 }
 0x1a9   :  { %v279_v14 = vadd.f32 %v278_v12, %v277_v10 }
 0x1aa   :  { %v284_v15 = vsel %vm276_vm7, %v275_v13, 0.0 }
 0x1ab   :  { %v280_v16 = vrot.slane %v279_v14, 2  ;;  %v285_v17 = vrot.slane %v284_v15, 4 }
 0x1ad   :  { %v281_v18 = vadd.f32 %v280_v16, %v279_v14  ;;  %v286_v19 = vadd.f32 %v285_v17, %v284_v15 }
 0x1af   :  { %v287_v20 = vrot.slane %v286_v19, 2  ;;  %v282_v21 = vrot.slane %v281_v18, 1 }
 0x1b1   :  { %v288_v22 = vadd.f32 %v287_v20, %v286_v19  ;;  %v283_v25 = vadd.f32 %v282_v21, %v281_v18 }
 0x1b3   :  { %v289_v23 = vrot.slane %v288_v22, 1 }
 0x1b5   :  { %v290_v26 = vadd.f32 %v289_v23, %v288_v22 }
 0x1b7   :  { %v294_v27 = vsel %vm293_vm8, %v290_v26, %v283_v25 }
 0x1b8   :  { %v299_v28 = vsel %vm276_vm7, %v294_v27, %v297_v24 }
 0x1b9   :  { %476 = vmatmul.mubr.msk.f32.vlgmr.msra.gmra.mrb[0].mxu1 %vm309_vm9, %v299_v28 }
 0x28c   :  { %v382_v29 = vpop.f32.mrb[0].mxu1 }
 0x28d   :  { %387 = vst.msk [vmem:[#allocation2] sm:$0x3] %vm386_vm10, %v382_v29  ;;  %v477_v30 = vpop.f32.mrb[1].mxu1 }
 0x28e   :  { %538 = shalt.err (!%p535_p4)
}
 0x28f   :  { %s539_s23 = scalar_lea.hbm %s705_s7, 32 }
 0x290   :  { %p540_p5 = scmp.ne.s32.totalorder %s705_s7, %s539_s23  ;;  %p543_p6 = scmp.lt.u32.totalorder %s539_s23, %s705_s7 }
 0x292   :  { %p545_p7 = pnand %p543_p6, %p540_p5 }
 0x294   :  { %548 = shalt.err (!%p545_p7)
}
 0x295   :  { %397 = dma.vmem_to_hbm [thread:$0]  %s395_s22, 32, %s705_s7, [#allocation3]  }
 0x296   :  { %549 = dma.done.wait [#allocation3], 32  }
 0x297   :  { %550 = vsyncadd [#allocation3], 4294967264 }
 0x298   :  { %401 = vsyncpa [#allocation3], 1 }

</bundles_post_ra>
